<compile_context>
chip_gen: v7x
topology: tpu7x:2x2x1
jax: 0.10.0
libtpu: 0.0.40
codegen_flags: <defaults>
</compile_context>

<pallas_src>
import numpy as np
import jax
import jax.numpy as jnp
from jax.experimental import pallas as pl
from jax.experimental.pallas import tpu as pltpu

# Edge topology for the "mid offset" maps (5 keypoints, 4 edges -> 16 mid channels).
EDGES = [[0, 1], [1, 2], [2, 3], [3, 4]]
KP_RADIUS = 8.0  # module __init__ parameter (deterministic, in-script)

N_KP = 5
N_SHORT = 2 * N_KP                       # 10
# per mid channel: the "from" keypoint (edges followed by reversed edges, x2 each)
_MID_FROM_KP = [kp for e in (EDGES + [ed[::-1] for ed in EDGES]) for kp in (e[0], e[0])]
N_MID = len(_MID_FROM_KP)                # 16
_MID_GROUPS = {k: [j for j, kp in enumerate(_MID_FROM_KP) if kp == k] for k in range(N_KP)}
_MID_COUNTS = [len(_MID_GROUPS[k]) for k in range(N_KP)]   # [2, 4, 4, 4, 2]
N_GT = N_KP + N_SHORT + N_MID            # 31


def _loss_kernel(pr_kp_ref, pr_s_ref, pr_m_ref, gt_ref, out_ref):
    """Each grid step writes its own (8,128) tile of partial sums:
       row0 bce_sum, row1 short |d|*mask sum, row2 short mask sum,
       row3 mid   |d|*mask sum, row4 mid   mask sum, rows 5-7 zero."""
    f32 = jnp.float32

    gt = gt_ref[0].astype(f32)           # (31, T)
    kp_t = gt[0:N_KP, :]                 # (5,  T)
    gt_s = gt[N_KP:N_KP + N_SHORT, :]    # (10, T)
    gt_m = gt[N_KP + N_SHORT:N_GT, :]    # (16, T)

    p = pr_kp_ref[0].astype(f32)         # (5,  T)
    pr_s = pr_s_ref[0].astype(f32)       # (10, T)
    pr_m = pr_m_ref[0].astype(f32)       # (16, T)

    # --- keypoint map BCE (summed; mean taken in the wrapper) ---
    log_p = jnp.maximum(jnp.log(p), -100.0)          # matches PyTorch log clamp
    log_1mp = jnp.maximum(jnp.log(1.0 - p), -100.0)
    bce_sum = jnp.sum(-(kp_t * log_p + (1.0 - kp_t) * log_1mp))

    # --- mask denominators, derived analytically from gt_kp ---
    s_den = 2.0 * jnp.sum(kp_t)
    m_den = f32(0.0)
    for k in range(N_KP):
        cnt = _MID_COUNTS[k]
        if cnt:
            m_den = m_den + float(cnt) * jnp.sum(kp_t[k:k + 1, :])

    # --- short offset numerator: group the 2 channels per keypoint ---
    d_s = jnp.abs(pr_s - gt_s)           # (10, T)
    s_acc = None
    for k in range(N_KP):
        pair = d_s[2 * k:2 * k + 1, :] + d_s[2 * k + 1:2 * k + 2, :]
        term = pair * kp_t[k:k + 1, :]
        s_acc = term if s_acc is None else s_acc + term
    s_num = jnp.sum(s_acc)

    # --- mid offset numerator: group channels by their source keypoint ---
    d_m = jnp.abs(pr_m - gt_m)           # (16, T)
    m_acc = None
    for k in range(N_KP):
        chans = _MID_GROUPS[k]
        if not chans:
            continue
        g = None
        for j in chans:
            dj = d_m[j:j + 1, :]
            g = dj if g is None else g + dj
        term = g * kp_t[k:k + 1, :]
        m_acc = term if m_acc is None else m_acc + term
    m_num = jnp.sum(m_acc)

    # --- write per-program partials (value replicated across lanes; wrapper
    #     reads lane 0) ---
    zero = f32(0.0)
    rows = (bce_sum, s_num, s_den, m_num, m_den, zero, zero, zero)
    tile = jnp.concatenate([jnp.full((1, 128), v, f32) for v in rows], axis=0)
    out_ref[0, 0, :, :] = tile


def _pick_hw_tile(hw, cap=16384):
    """Largest multiple of 128 that divides hw (<= cap); full dim if hw % 128 != 0."""
    if hw % 128 != 0:
        return hw                        # full-extent block is always legal
    t = (min(cap, hw) // 128) * 128
    while t >= 128:
        if hw % t == 0:
            return t
        t -= 128
    return hw


def detection_loss_all(prediction, groundtruth, kp_radius=KP_RADIUS):
    pr_kp, pr_short, pr_mid = prediction
    B, c_gt, H, W = groundtruth.shape
    assert c_gt == N_GT, f"expected {N_GT} groundtruth channels, got {c_gt}"
    HW = H * W
    T = _pick_hw_tile(HW)
    GH = HW // T

    def flat(x):
        return x.reshape(x.shape[0], x.shape[1], HW)   # keep native dtype (bf16 ok)

    pr_kp_f = flat(pr_kp)
    pr_s_f = flat(pr_short)
    pr_m_f = flat(pr_mid)
    gt_f = flat(groundtruth)

    in_specs = [
        pl.BlockSpec((1, N_KP, T), lambda b, h: (b, 0, h)),
        pl.BlockSpec((1, N_SHORT, T), lambda b, h: (b, 0, h)),
        pl.BlockSpec((1, N_MID, T), lambda b, h: (b, 0, h)),
        pl.BlockSpec((1, N_GT, T), lambda b, h: (b, 0, h)),
    ]
    out_specs = pl.BlockSpec((1, 1, 8, 128), lambda b, h: (b, h, 0, 0))

    partials = pl.pallas_call(
        _loss_kernel,
        out_shape=jax.ShapeDtypeStruct((B, GH, 8, 128), jnp.float32),
        grid=(B, GH),
        in_specs=in_specs,
        out_specs=out_specs,
        compiler_params=pltpu.CompilerParams(
            dimension_semantics=("parallel", "parallel"),
            vmem_limit_bytes=32 * 1024 * 1024),
    )(pr_kp_f, pr_s_f, pr_m_f, gt_f)

    sums = jnp.sum(partials[:, :, :, 0], axis=(0, 1))   # (8,) tiny reduction in JAX
    bce_sum, s_num, s_den, m_num, m_den = (sums[i] for i in range(5))

    loss_kp = bce_sum / jnp.float32(B * N_KP * H * W)   # BCE mean
    loss_short = (s_num / kp_radius) / (s_den + 1e-10)
    loss_mid = (m_num / kp_radius) / (m_den + 1e-10)
    return loss_kp + loss_short + 0.25 * loss_mid


def _reference_loss(prediction, groundtruth, kp_radius=KP_RADIUS):
    """Pure-JAX reference mirroring the PyTorch module."""
    pr_kp, pr_short, pr_mid = prediction
    gt_kp = groundtruth[:, :N_KP]
    gt_short = groundtruth[:, N_KP:N_KP + N_SHORT]
    gt_mid = groundtruth[:, N_KP + N_SHORT:]

    bce = -(gt_kp * jnp.maximum(jnp.log(pr_kp), -100.0)
            + (1.0 - gt_kp) * jnp.maximum(jnp.log(1.0 - pr_kp), -100.0))
    loss_kp = jnp.mean(bce)

    w_short = jnp.repeat(gt_kp, 2, axis=1)
    ls = jnp.abs(pr_short - gt_short) / kp_radius * w_short
    loss_short = jnp.sum(ls) / (jnp.sum(w_short) + 1e-10)

    w_mid = gt_kp[:, np.asarray(_MID_FROM_KP, dtype=np.int32)]
    lm = jnp.abs(pr_mid - gt_mid) / kp_radius * w_mid
    loss_mid = jnp.sum(lm) / (jnp.sum(w_mid) + 1e-10)

    return loss_kp + loss_short + 0.25 * loss_mid


if __name__ == "__main__":
    key = jax.random.PRNGKey(0)
    B, H, W = 2, 16, 16

    k1, k2, k3, k4, k5, k6 = jax.random.split(key, 6)
    pr_kp = jax.nn.sigmoid(jax.random.normal(k1, (B, N_KP, H, W), jnp.float32))
    pr_short = jax.random.normal(k2, (B, N_SHORT, H, W), jnp.float32)
    pr_mid = jax.random.normal(k3, (B, N_MID, H, W), jnp.float32)

    gt_kp = jax.random.bernoulli(k4, 0.3, (B, N_KP, H, W)).astype(jnp.float32)
    gt_short = jax.random.normal(k5, (B, N_SHORT, H, W), jnp.float32)
    gt_mid = jax.random.normal(k6, (B, N_MID, H, W), jnp.float32)
    groundtruth = jnp.concatenate([gt_kp, gt_short, gt_mid], axis=1)  # (B, 31, H, W)

    prediction = (pr_kp, pr_short, pr_mid)

    loss = detection_loss_all(prediction, groundtruth)
    jax.block_until_ready(loss)

    ref = _reference_loss(prediction, groundtruth)
    np.testing.assert_allclose(np.asarray(loss), np.asarray(ref), rtol=1e-5, atol=1e-5)

    print("KERNEL_OK")
</pallas_src>

<mosaic_0001>
module attributes {stable_mosaic.version = 11 : i64} {
  func.func @_loss_kernel(%arg0: i32, %arg1: i32, %arg2: memref<1x5x256xf32, #tpu.memory_space<vmem>>, %arg3: memref<1x10x256xf32, #tpu.memory_space<vmem>>, %arg4: memref<1x16x256xf32, #tpu.memory_space<vmem>>, %arg5: memref<1x31x256xf32, #tpu.memory_space<vmem>>, %arg6: memref<1x1x8x128xf32, #tpu.memory_space<vmem>>) attributes {dimension_semantics = [#tpu.dimension_semantics<parallel>, #tpu.dimension_semantics<parallel>], iteration_bounds = array<i64: 2, 1>, scalar_prefetch = 0 : i64, scratch_operands = 0 : i64, tpu.core_type = #tpu.core_type<tc>, window_params = [{transform_indices = @transform_0, window_bounds = array<i64: 1, 5, 256>}, {transform_indices = @transform_1, window_bounds = array<i64: 1, 10, 256>}, {transform_indices = @transform_2, window_bounds = array<i64: 1, 16, 256>}, {transform_indices = @transform_3, window_bounds = array<i64: 1, 31, 256>}, {transform_indices = @transform_4, window_bounds = array<i64: 1, 1, 8, 128>}]} {
    %c0 = arith.constant 0 : index
    %c0_0 = arith.constant 0 : index
    %c0_1 = arith.constant 0 : index
    %0 = vector.load %arg5[%c0, %c0_0, %c0_1] : memref<1x31x256xf32, #tpu.memory_space<vmem>>, vector<1x31x256xf32>
    %1 = vector.shape_cast %0 : vector<1x31x256xf32> to vector<31x256xf32>
    %2 = vector.extract_strided_slice %1 {offsets = [0, 0], sizes = [5, 256], strides = [1, 1]} : vector<31x256xf32> to vector<5x256xf32>
    %3 = vector.extract_strided_slice %1 {offsets = [5, 0], sizes = [10, 256], strides = [1, 1]} : vector<31x256xf32> to vector<10x256xf32>
    %4 = vector.extract_strided_slice %1 {offsets = [15, 0], sizes = [16, 256], strides = [1, 1]} : vector<31x256xf32> to vector<16x256xf32>
    %c0_2 = arith.constant 0 : index
    %c0_3 = arith.constant 0 : index
    %c0_4 = arith.constant 0 : index
    %5 = vector.load %arg2[%c0_2, %c0_3, %c0_4] : memref<1x5x256xf32, #tpu.memory_space<vmem>>, vector<1x5x256xf32>
    %6 = vector.shape_cast %5 : vector<1x5x256xf32> to vector<5x256xf32>
    %c0_5 = arith.constant 0 : index
    %c0_6 = arith.constant 0 : index
    %c0_7 = arith.constant 0 : index
    %7 = vector.load %arg3[%c0_5, %c0_6, %c0_7] : memref<1x10x256xf32, #tpu.memory_space<vmem>>, vector<1x10x256xf32>
    %8 = vector.shape_cast %7 : vector<1x10x256xf32> to vector<10x256xf32>
    %c0_8 = arith.constant 0 : index
    %c0_9 = arith.constant 0 : index
    %c0_10 = arith.constant 0 : index
    %9 = vector.load %arg4[%c0_8, %c0_9, %c0_10] : memref<1x16x256xf32, #tpu.memory_space<vmem>>, vector<1x16x256xf32>
    %10 = vector.shape_cast %9 : vector<1x16x256xf32> to vector<16x256xf32>
    %11 = math.log %6 : vector<5x256xf32>
    %cst = arith.constant -1.000000e+02 : f32
    %12 = vector.broadcast %cst : f32 to vector<5x256xf32>
    %13 = arith.maximumf %11, %12 : vector<5x256xf32>
    %cst_11 = arith.constant 1.000000e+00 : f32
    %14 = vector.broadcast %cst_11 : f32 to vector<5x256xf32>
    %15 = arith.subf %14, %6 : vector<5x256xf32>
    %16 = math.log %15 : vector<5x256xf32>
    %cst_12 = arith.constant -1.000000e+02 : f32
    %17 = vector.broadcast %cst_12 : f32 to vector<5x256xf32>
    %18 = arith.maximumf %16, %17 : vector<5x256xf32>
    %19 = arith.mulf %2, %13 : vector<5x256xf32>
    %cst_13 = arith.constant 1.000000e+00 : f32
    %20 = vector.broadcast %cst_13 : f32 to vector<5x256xf32>
    %21 = arith.subf %20, %2 : vector<5x256xf32>
    %22 = arith.mulf %21, %18 : vector<5x256xf32>
    %23 = arith.addf %19, %22 : vector<5x256xf32>
    %cst_14 = arith.constant 0.000000e+00 : f32
    %24 = vector.broadcast %cst_14 : f32 to vector<5x256xf32>
    %25 = arith.subf %24, %23 : vector<5x256xf32>
    %26 = vector.shape_cast %25 : vector<5x256xf32> to vector<1x5x256xf32>
    %cst_15 = arith.constant dense<0.000000e+00> : vector<1xf32>
    %27 = vector.multi_reduction <add>, %26, %cst_15 [1, 2] : vector<1x5x256xf32> to vector<1xf32>
    %28 = vector.shape_cast %27 : vector<1xf32> to vector<1x1x1xf32>
    %29 = vector.extract %28[0, 0, 0] : f32 from vector<1x1x1xf32>
    %30 = vector.shape_cast %2 : vector<5x256xf32> to vector<1x5x256xf32>
    %cst_16 = arith.constant dense<0.000000e+00> : vector<1xf32>
    %31 = vector.multi_reduction <add>, %30, %cst_16 [1, 2] : vector<1x5x256xf32> to vector<1xf32>
    %32 = vector.shape_cast %31 : vector<1xf32> to vector<1x1x1xf32>
    %33 = vector.extract %32[0, 0, 0] : f32 from vector<1x1x1xf32>
    %cst_17 = arith.constant 2.000000e+00 : f32
    %34 = arith.mulf %cst_17, %33 : f32
    %35 = vector.extract_strided_slice %2 {offsets = [0, 0], sizes = [1, 256], strides = [1, 1]} : vector<5x256xf32> to vector<1x256xf32>
    %36 = vector.shape_cast %35 : vector<1x256xf32> to vector<1x1x256xf32>
    %cst_18 = arith.constant dense<0.000000e+00> : vector<1xf32>
    %37 = vector.multi_reduction <add>, %36, %cst_18 [1, 2] : vector<1x1x256xf32> to vector<1xf32>
    %38 = vector.shape_cast %37 : vector<1xf32> to vector<1x1x1xf32>
    %39 = vector.extract %38[0, 0, 0] : f32 from vector<1x1x1xf32>
    %cst_19 = arith.constant 2.000000e+00 : f32
    %40 = arith.mulf %cst_19, %39 : f32
    %cst_20 = arith.constant 0.000000e+00 : f32
    %41 = arith.addf %cst_20, %40 : f32
    %42 = vector.extract_strided_slice %2 {offsets = [1, 0], sizes = [1, 256], strides = [1, 1]} : vector<5x256xf32> to vector<1x256xf32>
    %43 = vector.shape_cast %42 : vector<1x256xf32> to vector<1x1x256xf32>
    %cst_21 = arith.constant dense<0.000000e+00> : vector<1xf32>
    %44 = vector.multi_reduction <add>, %43, %cst_21 [1, 2] : vector<1x1x256xf32> to vector<1xf32>
    %45 = vector.shape_cast %44 : vector<1xf32> to vector<1x1x1xf32>
    %46 = vector.extract %45[0, 0, 0] : f32 from vector<1x1x1xf32>
    %cst_22 = arith.constant 4.000000e+00 : f32
    %47 = arith.mulf %cst_22, %46 : f32
    %48 = arith.addf %41, %47 : f32
    %49 = vector.extract_strided_slice %2 {offsets = [2, 0], sizes = [1, 256], strides = [1, 1]} : vector<5x256xf32> to vector<1x256xf32>
    %50 = vector.shape_cast %49 : vector<1x256xf32> to vector<1x1x256xf32>
    %cst_23 = arith.constant dense<0.000000e+00> : vector<1xf32>
    %51 = vector.multi_reduction <add>, %50, %cst_23 [1, 2] : vector<1x1x256xf32> to vector<1xf32>
    %52 = vector.shape_cast %51 : vector<1xf32> to vector<1x1x1xf32>
    %53 = vector.extract %52[0, 0, 0] : f32 from vector<1x1x1xf32>
    %cst_24 = arith.constant 4.000000e+00 : f32
    %54 = arith.mulf %cst_24, %53 : f32
    %55 = arith.addf %48, %54 : f32
    %56 = vector.extract_strided_slice %2 {offsets = [3, 0], sizes = [1, 256], strides = [1, 1]} : vector<5x256xf32> to vector<1x256xf32>
    %57 = vector.shape_cast %56 : vector<1x256xf32> to vector<1x1x256xf32>
    %cst_25 = arith.constant dense<0.000000e+00> : vector<1xf32>
    %58 = vector.multi_reduction <add>, %57, %cst_25 [1, 2] : vector<1x1x256xf32> to vector<1xf32>
    %59 = vector.shape_cast %58 : vector<1xf32> to vector<1x1x1xf32>
    %60 = vector.extract %59[0, 0, 0] : f32 from vector<1x1x1xf32>
    %cst_26 = arith.constant 4.000000e+00 : f32
    %61 = arith.mulf %cst_26, %60 : f32
    %62 = arith.addf %55, %61 : f32
    %63 = vector.extract_strided_slice %2 {offsets = [4, 0], sizes = [1, 256], strides = [1, 1]} : vector<5x256xf32> to vector<1x256xf32>
    %64 = vector.shape_cast %63 : vector<1x256xf32> to vector<1x1x256xf32>
    %cst_27 = arith.constant dense<0.000000e+00> : vector<1xf32>
    %65 = vector.multi_reduction <add>, %64, %cst_27 [1, 2] : vector<1x1x256xf32> to vector<1xf32>
    %66 = vector.shape_cast %65 : vector<1xf32> to vector<1x1x1xf32>
    %67 = vector.extract %66[0, 0, 0] : f32 from vector<1x1x1xf32>
    %cst_28 = arith.constant 2.000000e+00 : f32
    %68 = arith.mulf %cst_28, %67 : f32
    %69 = arith.addf %62, %68 : f32
    %70 = arith.subf %8, %3 : vector<10x256xf32>
    %71 = math.absf %70 : vector<10x256xf32>
    %72 = vector.extract_strided_slice %71 {offsets = [0, 0], sizes = [1, 256], strides = [1, 1]} : vector<10x256xf32> to vector<1x256xf32>
    %73 = vector.extract_strided_slice %71 {offsets = [1, 0], sizes = [1, 256], strides = [1, 1]} : vector<10x256xf32> to vector<1x256xf32>
    %74 = arith.addf %72, %73 : vector<1x256xf32>
    %75 = vector.extract_strided_slice %2 {offsets = [0, 0], sizes = [1, 256], strides = [1, 1]} : vector<5x256xf32> to vector<1x256xf32>
    %76 = arith.mulf %74, %75 : vector<1x256xf32>
    %77 = vector.extract_strided_slice %71 {offsets = [2, 0], sizes = [1, 256], strides = [1, 1]} : vector<10x256xf32> to vector<1x256xf32>
    %78 = vector.extract_strided_slice %71 {offsets = [3, 0], sizes = [1, 256], strides = [1, 1]} : vector<10x256xf32> to vector<1x256xf32>
    %79 = arith.addf %77, %78 : vector<1x256xf32>
    %80 = vector.extract_strided_slice %2 {offsets = [1, 0], sizes = [1, 256], strides = [1, 1]} : vector<5x256xf32> to vector<1x256xf32>
    %81 = arith.mulf %79, %80 : vector<1x256xf32>
    %82 = arith.addf %76, %81 : vector<1x256xf32>
    %83 = vector.extract_strided_slice %71 {offsets = [4, 0], sizes = [1, 256], strides = [1, 1]} : vector<10x256xf32> to vector<1x256xf32>
    %84 = vector.extract_strided_slice %71 {offsets = [5, 0], sizes = [1, 256], strides = [1, 1]} : vector<10x256xf32> to vector<1x256xf32>
    %85 = arith.addf %83, %84 : vector<1x256xf32>
    %86 = vector.extract_strided_slice %2 {offsets = [2, 0], sizes = [1, 256], strides = [1, 1]} : vector<5x256xf32> to vector<1x256xf32>
    %87 = arith.mulf %85, %86 : vector<1x256xf32>
    %88 = arith.addf %82, %87 : vector<1x256xf32>
    %89 = vector.extract_strided_slice %71 {offsets = [6, 0], sizes = [1, 256], strides = [1, 1]} : vector<10x256xf32> to vector<1x256xf32>
    %90 = vector.extract_strided_slice %71 {offsets = [7, 0], sizes = [1, 256], strides = [1, 1]} : vector<10x256xf32> to vector<1x256xf32>
    %91 = arith.addf %89, %90 : vector<1x256xf32>
    %92 = vector.extract_strided_slice %2 {offsets = [3, 0], sizes = [1, 256], strides = [1, 1]} : vector<5x256xf32> to vector<1x256xf32>
    %93 = arith.mulf %91, %92 : vector<1x256xf32>
    %94 = arith.addf %88, %93 : vector<1x256xf32>
    %95 = vector.extract_strided_slice %71 {offsets = [8, 0], sizes = [1, 256], strides = [1, 1]} : vector<10x256xf32> to vector<1x256xf32>
    %96 = vector.extract_strided_slice %71 {offsets = [9, 0], sizes = [1, 256], strides = [1, 1]} : vector<10x256xf32> to vector<1x256xf32>
    %97 = arith.addf %95, %96 : vector<1x256xf32>
    %98 = vector.extract_strided_slice %2 {offsets = [4, 0], sizes = [1, 256], strides = [1, 1]} : vector<5x256xf32> to vector<1x256xf32>
    %99 = arith.mulf %97, %98 : vector<1x256xf32>
    %100 = arith.addf %94, %99 : vector<1x256xf32>
    %101 = vector.shape_cast %100 : vector<1x256xf32> to vector<1x1x256xf32>
    %cst_29 = arith.constant dense<0.000000e+00> : vector<1xf32>
    %102 = vector.multi_reduction <add>, %101, %cst_29 [1, 2] : vector<1x1x256xf32> to vector<1xf32>
    %103 = vector.shape_cast %102 : vector<1xf32> to vector<1x1x1xf32>
    %104 = vector.extract %103[0, 0, 0] : f32 from vector<1x1x1xf32>
    %105 = arith.subf %10, %4 : vector<16x256xf32>
    %106 = math.absf %105 : vector<16x256xf32>
    %107 = vector.extract_strided_slice %106 {offsets = [0, 0], sizes = [1, 256], strides = [1, 1]} : vector<16x256xf32> to vector<1x256xf32>
    %108 = vector.extract_strided_slice %106 {offsets = [1, 0], sizes = [1, 256], strides = [1, 1]} : vector<16x256xf32> to vector<1x256xf32>
    %109 = arith.addf %107, %108 : vector<1x256xf32>
    %110 = vector.extract_strided_slice %2 {offsets = [0, 0], sizes = [1, 256], strides = [1, 1]} : vector<5x256xf32> to vector<1x256xf32>
    %111 = arith.mulf %109, %110 : vector<1x256xf32>
    %112 = vector.extract_strided_slice %106 {offsets = [2, 0], sizes = [1, 256], strides = [1, 1]} : vector<16x256xf32> to vector<1x256xf32>
    %113 = vector.extract_strided_slice %106 {offsets = [3, 0], sizes = [1, 256], strides = [1, 1]} : vector<16x256xf32> to vector<1x256xf32>
    %114 = arith.addf %112, %113 : vector<1x256xf32>
    %115 = vector.extract_strided_slice %106 {offsets = [8, 0], sizes = [1, 256], strides = [1, 1]} : vector<16x256xf32> to vector<1x256xf32>
    %116 = arith.addf %114, %115 : vector<1x256xf32>
    %117 = vector.extract_strided_slice %106 {offsets = [9, 0], sizes = [1, 256], strides = [1, 1]} : vector<16x256xf32> to vector<1x256xf32>
    %118 = arith.addf %116, %117 : vector<1x256xf32>
    %119 = vector.extract_strided_slice %2 {offsets = [1, 0], sizes = [1, 256], strides = [1, 1]} : vector<5x256xf32> to vector<1x256xf32>
    %120 = arith.mulf %118, %119 : vector<1x256xf32>
    %121 = arith.addf %111, %120 : vector<1x256xf32>
    %122 = vector.extract_strided_slice %106 {offsets = [4, 0], sizes = [1, 256], strides = [1, 1]} : vector<16x256xf32> to vector<1x256xf32>
    %123 = vector.extract_strided_slice %106 {offsets = [5, 0], sizes = [1, 256], strides = [1, 1]} : vector<16x256xf32> to vector<1x256xf32>
    %124 = arith.addf %122, %123 : vector<1x256xf32>
    %125 = vector.extract_strided_slice %106 {offsets = [10, 0], sizes = [1, 256], strides = [1, 1]} : vector<16x256xf32> to vector<1x256xf32>
    %126 = arith.addf %124, %125 : vector<1x256xf32>
    %127 = vector.extract_strided_slice %106 {offsets = [11, 0], sizes = [1, 256], strides = [1, 1]} : vector<16x256xf32> to vector<1x256xf32>
    %128 = arith.addf %126, %127 : vector<1x256xf32>
    %129 = vector.extract_strided_slice %2 {offsets = [2, 0], sizes = [1, 256], strides = [1, 1]} : vector<5x256xf32> to vector<1x256xf32>
    %130 = arith.mulf %128, %129 : vector<1x256xf32>
    %131 = arith.addf %121, %130 : vector<1x256xf32>
    %132 = vector.extract_strided_slice %106 {offsets = [6, 0], sizes = [1, 256], strides = [1, 1]} : vector<16x256xf32> to vector<1x256xf32>
    %133 = vector.extract_strided_slice %106 {offsets = [7, 0], sizes = [1, 256], strides = [1, 1]} : vector<16x256xf32> to vector<1x256xf32>
    %134 = arith.addf %132, %133 : vector<1x256xf32>
    %135 = vector.extract_strided_slice %106 {offsets = [12, 0], sizes = [1, 256], strides = [1, 1]} : vector<16x256xf32> to vector<1x256xf32>
    %136 = arith.addf %134, %135 : vector<1x256xf32>
    %137 = vector.extract_strided_slice %106 {offsets = [13, 0], sizes = [1, 256], strides = [1, 1]} : vector<16x256xf32> to vector<1x256xf32>
    %138 = arith.addf %136, %137 : vector<1x256xf32>
    %139 = vector.extract_strided_slice %2 {offsets = [3, 0], sizes = [1, 256], strides = [1, 1]} : vector<5x256xf32> to vector<1x256xf32>
    %140 = arith.mulf %138, %139 : vector<1x256xf32>
    %141 = arith.addf %131, %140 : vector<1x256xf32>
    %142 = vector.extract_strided_slice %106 {offsets = [14, 0], sizes = [1, 256], strides = [1, 1]} : vector<16x256xf32> to vector<1x256xf32>
    %143 = vector.extract_strided_slice %106 {offsets = [15, 0], sizes = [1, 256], strides = [1, 1]} : vector<16x256xf32> to vector<1x256xf32>
    %144 = arith.addf %142, %143 : vector<1x256xf32>
    %145 = vector.extract_strided_slice %2 {offsets = [4, 0], sizes = [1, 256], strides = [1, 1]} : vector<5x256xf32> to vector<1x256xf32>
    %146 = arith.mulf %144, %145 : vector<1x256xf32>
    %147 = arith.addf %141, %146 : vector<1x256xf32>
    %148 = vector.shape_cast %147 : vector<1x256xf32> to vector<1x1x256xf32>
    %cst_30 = arith.constant dense<0.000000e+00> : vector<1xf32>
    %149 = vector.multi_reduction <add>, %148, %cst_30 [1, 2] : vector<1x1x256xf32> to vector<1xf32>
    %150 = vector.shape_cast %149 : vector<1xf32> to vector<1x1x1xf32>
    %151 = vector.extract %150[0, 0, 0] : f32 from vector<1x1x1xf32>
    %152 = vector.broadcast %29 : f32 to vector<1x128xf32>
    %153 = vector.broadcast %104 : f32 to vector<1x128xf32>
    %154 = vector.broadcast %34 : f32 to vector<1x128xf32>
    %155 = vector.broadcast %151 : f32 to vector<1x128xf32>
    %156 = vector.broadcast %69 : f32 to vector<1x128xf32>
    %cst_31 = arith.constant 0.000000e+00 : f32
    %157 = vector.broadcast %cst_31 : f32 to vector<1x128xf32>
    %cst_32 = arith.constant 0.000000e+00 : f32
    %158 = vector.broadcast %cst_32 : f32 to vector<1x128xf32>
    %cst_33 = arith.constant 0.000000e+00 : f32
    %159 = vector.broadcast %cst_33 : f32 to vector<1x128xf32>
    %160 = tpu.concatenate %152, %153, %154, %155, %156, %157, %158, %159 in 0 : vector<1x128xf32>, vector<1x128xf32>, vector<1x128xf32>, vector<1x128xf32>, vector<1x128xf32>, vector<1x128xf32>, vector<1x128xf32>, vector<1x128xf32> -> vector<8x128xf32>
    %c0_34 = arith.constant 0 : index
    %c0_35 = arith.constant 0 : index
    %c0_36 = arith.constant 0 : index
    %c0_37 = arith.constant 0 : index
    %161 = vector.load %arg6[%c0_34, %c0_35, %c0_36, %c0_37] : memref<1x1x8x128xf32, #tpu.memory_space<vmem>>, vector<1x1x8x128xf32>
    %162 = vector.shape_cast %161 : vector<1x1x8x128xf32> to vector<8x128xf32>
    %163 = vector.shape_cast %160 : vector<8x128xf32> to vector<1x1x8x128xf32>
    tpu.vector_store %arg6[%c0_34, %c0_35, %c0_36, %c0_37], %163 {strides = array<i32>} : memref<1x1x8x128xf32, #tpu.memory_space<vmem>>, vector<1x1x8x128xf32>,
    return
  }
  func.func @transform_0(%arg0: i32, %arg1: i32) -> (i32, i32, i32) {
    %c0_i32 = arith.constant 0 : i32
    %c0_i32_0 = arith.constant 0 : i32
    return %arg0, %c0_i32, %arg1 : i32, i32, i32
  }
  func.func @transform_1(%arg0: i32, %arg1: i32) -> (i32, i32, i32) {
    %c0_i32 = arith.constant 0 : i32
    %c0_i32_0 = arith.constant 0 : i32
    return %arg0, %c0_i32, %arg1 : i32, i32, i32
  }
  func.func @transform_2(%arg0: i32, %arg1: i32) -> (i32, i32, i32) {
    %c0_i32 = arith.constant 0 : i32
    %c0_i32_0 = arith.constant 0 : i32
    return %arg0, %c0_i32, %arg1 : i32, i32, i32
  }
  func.func @transform_3(%arg0: i32, %arg1: i32) -> (i32, i32, i32) {
    %c0_i32 = arith.constant 0 : i32
    %c0_i32_0 = arith.constant 0 : i32
    return %arg0, %c0_i32, %arg1 : i32, i32, i32
  }
  func.func @transform_4(%arg0: i32, %arg1: i32) -> (i32, i32, i32, i32) {
    %c0_i32 = arith.constant 0 : i32
    %c0_i32_0 = arith.constant 0 : i32
    %c0_i32_1 = arith.constant 0 : i32
    return %arg0, %arg1, %c0_i32, %c0_i32_0 : i32, i32, i32, i32
  }
}

</mosaic_0001>

<bundles_post_ra>
// kernel: tpu_custom_call.1
= control target key start
LH: loop header
LB: loop body
LE: loop exit
PB: predicated region body
PF: predicated region fallthrough
CT: control target
= control target key end

     0   :  { %s1317_s0 = inlined_call_operand.vmem [shape: f32[2,5,256], index: 0, kind: input, shape index: {}]   ;;  %s1318_s1 = inlined_call_operand.vmem [shape: f32[2,10,256], index: 1, kind: input, shape index: {}]   ;;  %s1319_s2 = inlined_call_operand.vmem [shape: f32[2,16,256], index: 2, kind: input, shape index: {}]   ;;  %s1320_s3 = inlined_call_operand.vmem [shape: f32[2,31,256], index: 3, kind: input, shape index: {}]   ;;  %s1321_s4 = inlined_call_operand.hbm [shape: f32[2,1,8,128], index: 4, kind: output, shape index: {}]  }
   0x1   :  { %1322 = sst [smem:[#allocation5_spill]] %s1317_s0 }
   0x2   :  { %1323 = sst [smem:[#allocation6_spill]] %s1318_s1 }
   0x3   :  { %1324 = sst [smem:[#allocation7_spill]] %s1319_s2 }
   0x4   :  { %1325 = sst [smem:[#allocation8_spill]] %s1320_s3 }
   0x5   :  { %9 = vsyncpa [#allocation3], 0 }
   0x6   :  { %11 = vsyncpa [#allocation3 + $0x1], 0  ;;  %s1063_s15 = smov 0   ;;  %s1065_s16 = smov 0  }
   0x7   :  { %s1067_s17 = smov 0   ;;  %s1069_s18 = smov 0  }
   0x8   :  { %s1071_s19 = smov 0   ;;  %s1073_s20 = smov 0  }
   0x9 LB: > { %s854_s21 = sadd.s32 4294967295, %s1035_s20   ;;  %s855_s22 = sadd.s32 4294967294, %s1035_s20   ;;  %s1035_s20 = sphi %s1073_s20, %s17_s20   ;;  %s1031_s19 = sphi %s1071_s19, %s1336_s19   ;;  %s1027_s18 = sphi %s1069_s18, %s1335_s18   ;;  %s1023_s17 = sphi %s1067_s17, %s1334_s17   ;;  %s1019_s16 = sphi %s1065_s16, %s1333_s16   ;;  %s1015_s15 = sphi %s1063_s15, %s1332_s15  }
   0xa   : > { %s29_s23 = sadd.s32 1, %s1031_s19  ;;  %s150_s24 = sadd.s32 1, %s1023_s17 }
   0xb   : > { %p31_p0 = scmp.ge.s32.totalorder %s29_s23, 2  ;;  %p160_p1 = scmp.ne.s32.totalorder %s1023_s17, %s1019_s16 }
   0xc   : > { %p161_p2 = scmp.eq.s32.totalorder %s854_s21, 1  ;;  %p166_p3 = scmp.ne.s32.totalorder %s1019_s16, %s1015_s15 }
   0xd   : > { %s1338_s23 = smov (%p31_p0, %s29_s23), 0  ;;  %p167_p5 = scmp.eq.s32.totalorder %s855_s22, 1 }
   0xe   : > { %p1103_p4 = por %p161_p2, %p160_p1  ;;  %s145_s26 = ssub.s32 %s1031_s19, %s1338_s23 }
   0xf   : > { %p858_p6 = scmp.ge.s32.totalorder %s1035_s20, 1  ;;  %p148_p7 = scmp.eq.s32.totalorder %s145_s26, 0 }
  0x10   : > { %p1110_p8 = por %p167_p5, %p166_p3  ;;  %p237_p9 = scmp.lt.s32.totalorder %s1035_s20, 3 }
  0x11   : > { %s1116_s28 = scalar_select %p148_p7, %s1023_s17, %s150_s24  }
  0x12   : > { %p238_p10 = pnand %p858_p6, %p237_p9 }
  0x13   : > { %p295_p11 = scmp.lt.s32.totalorder (!%p238_p10), %s1027_s18, 1  ;;  %vm376_vm0 = vcmask (!%p238_p10), 1044480   ;;  %s1328_s3 = sld [smem:[#allocation8_spill]] (!%p238_p10)  ;;  %vm402_vm1 = vcmask (!%p238_p10), 1040384   ;;  %vm493_vm2 = vcmask (!%p238_p10), 1042432   ;;  %vm700_vm3 = vcmask (!%p238_p10), 1041408  }
  0x14   : > { %241 = sbr.rel (%p238_p10) target bundleno = 311 (0x137), region = 36  ;;  %s1329_s0 = sld [smem:[#allocation5_spill]] (!%p238_p10)  ;;  %vm703_vm4 = vcmask (!%p238_p10), 1043456   ;;  %vm706_vm5 = vcmask (!%p238_p10), 1045504   ;;  %vm708_vm6 = vcmask (!%p238_p10), 1046528  }
  0x15   : > { %s1330_s1 = sld [smem:[#allocation6_spill]] (!%p238_p10)  ;;  %s1331_s2 = sld [smem:[#allocation7_spill]] (!%p238_p10) }
  0x16   : > { %s291_s24 = sand.u32 (!%p238_p10), 1, %s1019_s16  }
  0x1b   : > { %s1120_s29 = scalar_select %p295_p11, %s1027_s18, 1 }
  0x1d   : > { %s875_s30 = sshll.u32 %s1120_s29, 6  ;;  %s872_s5 = sshll.u32 %s1120_s29, 4 }
  0x1e   : > { %s1127_s8 = scalar_lea.vmem %s1328_s3, %s875_s30  ;;  %s302_s11 = scalar_lea.vmem %s1329_s0, %s872_s5 }
  0x1f   : > { %v1133_v0 = vld [vmem:[%s1127_s8] sm:$0xff]  ;;  %v1136_v1 = vld [vmem:[%s1127_s8 + $0x8] sm:$0xff]  ;;  %s873_s12 = sshll.u32 %s1120_s29, 5  ;;  %v1159_v18 = vld [vmem:[%s1127_s8 + $0x10] sm:$0xff] }
  0x20   : > { %v342_v2 = vld [vmem:[%s302_s11] sm:$0x1f]  ;;  %v389_v3 = vsel %vm376_vm0, %v1133_v0, 0.0  ;;  %v390_v4 = vsel %vm376_vm0, %v1136_v1, 0.0  ;;  %v403_v5 = vsel %vm402_vm1, %v1133_v0, 0.0  ;;  %v404_v6 = vsel %vm402_vm1, %v1136_v1, 0.0  ;;  %s312_s21 = scalar_lea.vmem %s1330_s1, %s873_s12  ;;  %s322_s26 = scalar_lea.vmem %s1331_s2, %s873_s12 }
  0x21   : > { %v343_v7 = vld [vmem:[%s302_s11 + $0x8] sm:$0x1f]  ;;  %v391_v8 = vadd.f32 %v390_v4, %v389_v3  ;;  %v405_v9 = vadd.f32 %v404_v6, %v403_v5  ;;  %v419_v10 = vrot.slane %v1133_v0, 1  ;;  %v420_v11 = vrot.slane %v1136_v1, 1  ;;  %v1164_v22 = vld [vmem:[%s1127_s8 + $0x18] sm:$0xff]  ;;  %v344_v26 = vld [vmem:[%s312_s21] sm:$0xff] }
  0x22   : > { %v455_v12 = vrot.slane %v1133_v0, 3  ;;  %v456_v13 = vrot.slane %v1136_v1, 3  ;;  %949 = vlog2.f32 %v342_v2  ;;  %v358_v14 = vsub.f32 1.0, %v342_v2  ;;  %v346_v23 = vld [vmem:[%s312_s21 + $0x10] sm:$0x3]  ;;  %v345_v31 = vld [vmem:[%s312_s21 + $0x8] sm:$0xff] }
  0x23   : > { %392 = vadd.xlane.f32.xlu0 %v391_v8  ;;  %406 = vadd.xlane.f32.xlu1 %v405_v9  ;;  %v423_v15 = vsel %vm402_vm1, %v419_v10, 0.0  ;;  %v424_v16 = vsel %vm402_vm1, %v420_v11, 0.0  ;;  %951 = vlog2.f32 %v343_v7  ;;  %v359_v17 = vsub.f32 1.0, %v343_v7  ;;  %v347_v27 = vld [vmem:[%s312_s21 + $0x18] sm:$0x3]  ;;  %s859_s1 = sshll.u32 %s291_s24, 3 }
  0x24   : > { %v425_v19 = vadd.f32 %v424_v16, %v423_v15  ;;  %v459_v20 = vsel %vm402_vm1, %v455_v12, 0.0  ;;  %v460_v21 = vsel %vm402_vm1, %v456_v13, 0.0  ;;  %953 = vlog2.f32 %v358_v14 }
  0x25   : > { %955 = vlog2.f32 %v359_v17  ;;  %v461_v24 = vadd.f32 %v460_v21, %v459_v20  ;;  %v368_v25 = vsub.f32 1.0, %v1133_v0  ;;  %v1168_v28 = vrot.slane %v1133_v0, 5 }
  0x26   : > { %v495_v29 = vrot.slane %v1159_v18, 5  ;;  %v369_v30 = vsub.f32 1.0, %v1136_v1  ;;  %v473_v32 = vrot.slane %v1133_v0, 4  ;;  %v1174_v33 = vrot.slane %v1136_v1, 5 }
  0x27   : > { %426 = vadd.xlane.f32.xlu1 %v425_v19  ;;  %v498_v34 = vrot.slane %v1164_v22, 5  ;;  %v474_v35 = vrot.slane %v1136_v1, 4  ;;  %v522_v38 = vrot.slane %v1133_v0, 7  ;;  %v523_v42 = vrot.slane %v1136_v1, 7 }
  0x28   : > { %v496_v36 = vsel %vm493_vm2, %v1168_v28, %v495_v29  ;;  %v506_v37 = vsub.f32 %v346_v23, %v495_v29  ;;  %v1185_v45 = vrot.slane %v1133_v0, 6  ;;  %v437_v46 = vrot.slane %v1133_v0, 2 }
  0x29   : > { %v499_v39 = vsel %vm493_vm2, %v1174_v33, %v498_v34  ;;  %v504_v40 = vsub.f32 %v344_v26, %v496_v36  ;;  %v507_v41 = vsub.f32 %v347_v27, %v498_v34  ;;  %v1189_v49 = vrot.slane %v1136_v1, 6 }
  0x2a   : > { %v505_v43 = vsub.f32 %v345_v31, %v499_v39  ;;  %v510_v44 = vand.u32 2147483647, %v506_v37  ;;  %v438_v50 = vrot.slane %v1136_v1, 2  ;;  %v590_v54 = vrot.slane %v1159_v18, 7 }
  0x2b   : > { %462 = vadd.xlane.f32.xlu1 %v461_v24  ;;  %v508_v47 = vand.u32 2147483647, %v504_v40  ;;  %v511_v48 = vand.u32 2147483647, %v507_v41  ;;  %v593_v55 = vrot.slane %v1164_v22, 7  ;;  %v1197_v60 = vsel %vm402_vm1, %v473_v32, 0.0 }
  0x2c   : > { %v950_v51 = vpop.eup %949  ;;  %v509_v52 = vand.u32 2147483647, %v505_v43  ;;  %v564_v53 = vrot.slane %v510_v44, 1  ;;  %v1200_v2 = vsel %vm402_vm1, %v437_v46, 0.0  ;;  %v1203_v3 = vsel %vm402_vm1, %v438_v50, 0.0  ;;  %v338_v43 = vld [vmem:[%s1127_s8 + $0x20] sm:$0xff] }
  0x2d   : > { %v952_v56 = vpop.eup %951  ;;  %v353_v57 = vmul.f32 0.6931472, %v950_v51  ;;  %v514_v58 = vrot.slane %v508_v47, 1  ;;  %v565_v59 = vrot.slane %v511_v48, 1  ;;  %v341_v50 = vld [vmem:[%s1127_s8 + $0x38] sm:$0x7f]  ;;  %v443_v18 = vadd.f32 %v1203_v3, %v1200_v2 }
  0x2e   : > { %v954_v61 = vpop.eup %953  ;;  %v355_v62 = vmul.f32 0.6931472, %v952_v56  ;;  %v515_v63 = vrot.slane %v509_v52, 1  ;;  %v568_v8 = vadd.f32 %v564_v53, %v510_v44  ;;  %v339_v44 = vld [vmem:[%s1127_s8 + $0x28] sm:$0xff]  ;;  %v478_v22 = vsel %vm402_vm1, %v474_v35, 0.0 }
  0x2f   : > { %v956_v4 = vpop.eup %955  ;;  %v356_v5 = vmax.f32 %v353_v57, -100.0  ;;  %v361_v6 = vmul.f32 0.6931472, %v954_v61  ;;  %v518_v7 = vadd.f32 %v514_v58, %v508_v47  ;;  %v569_v12 = vadd.f32 %v565_v59, %v511_v48  ;;  %v340_v48 = vld [vmem:[%s1127_s8 + $0x30] sm:$0x7f] }
  0x30   : > { %v357_v9 = vmax.f32 %v355_v62, -100.0  ;;  %v363_v10 = vmul.f32 0.6931472, %v956_v4  ;;  %v519_v11 = vadd.f32 %v515_v63, %v509_v52  ;;  %v570_v53 = vmul.f32 %v568_v8, %v473_v32  ;;  %v348_v4 = vld [vmem:[%s322_s26] sm:$0xff] }
  0x31   : > { %v364_v13 = vmax.f32 %v361_v6, -100.0  ;;  %v366_v14 = vmul.f32 %v356_v5, %v1133_v0  ;;  %v520_v15 = vmul.f32 %v518_v7, %v1133_v0  ;;  %v526_v16 = vmul.f32 %v522_v38, %v518_v7  ;;  %v349_v5 = vld [vmem:[%s322_s26 + $0x8] sm:$0xff]  ;;  %v350_v6 = vld [vmem:[%s322_s26 + $0x10] sm:$0xff] }
  0x32   : > { %v365_v17 = vmax.f32 %v363_v10, -100.0  ;;  %v367_v19 = vmul.f32 %v357_v9, %v1136_v1  ;;  %v521_v20 = vmul.f32 %v519_v11, %v1136_v1  ;;  %v527_v21 = vmul.f32 %v523_v42, %v519_v11 }
  0x33   : > { %v370_v23 = vmul.f32 %v368_v25, %v364_v13  ;;  %v530_v24 = vrot.slane %v526_v16, 2  ;;  %v540_v26 = vmul.f32 %v1185_v45, %v518_v7  ;;  %v541_v27 = vmul.f32 %v1189_v49, %v519_v11  ;;  %v351_v13 = vld [vmem:[%s322_s26 + $0x18] sm:$0xff] }
  0x34   : > { %v371_v29 = vmul.f32 %v369_v30, %v365_v17  ;;  %v531_v31 = vrot.slane %v527_v21, 2  ;;  %v552_v34 = vmul.f32 %v518_v7, %v1168_v28  ;;  %v553_v36 = vmul.f32 %v519_v11, %v1174_v33 }
  0x35   : > { %v372_v37 = vadd.f32 %v370_v23, %v366_v14  ;;  %v534_v39 = vadd.f32 %v530_v24, %v520_v15  ;;  %v544_v40 = vrot.slane %v540_v26, 4  ;;  %v545_v41 = vrot.slane %v541_v27, 4 }
  0x36   : > { %v373_v25 = vadd.f32 %v371_v29, %v367_v19  ;;  %v535_v46 = vadd.f32 %v531_v31, %v521_v20  ;;  %v556_v30 = vrot.slane %v552_v34, 6  ;;  %v557_v47 = vrot.slane %v553_v36, 6 }
  0x37   : > { %v374_v51 = vsub.f32 0.0, %v372_v37  ;;  %v548_v52 = vadd.f32 %v544_v40, %v534_v39  ;;  %v571_v56 = vmul.f32 %v569_v12, %v474_v35  ;;  %v591_v59 = vrot.slane %v338_v43, 7 }
  0x38   : > { %v375_v57 = vsub.f32 0.0, %v373_v25  ;;  %v549_v58 = vadd.f32 %v545_v41, %v535_v46  ;;  %v594_v61 = vrot.slane %v339_v44, 7  ;;  %v596_v7 = vrot.slane %v340_v48, 7 }
  0x39   : > { %v377_v62 = vsel %vm376_vm0, %v374_v51, 0.0  ;;  %v560_v63 = vadd.f32 %v556_v30, %v548_v52  ;;  %v598_v9 = vrot.slane %v341_v50, 7  ;;  %v592_v32 = vsel %vm402_vm1, %v590_v54, %v591_v59 }
  0x3a   : > { %v378_v10 = vsel %vm376_vm0, %v375_v57, 0.0  ;;  %v561_v11 = vadd.f32 %v557_v47, %v549_v58  ;;  %v595_v8 = vsel %vm402_vm1, %v593_v55, %v594_v61  ;;  %v597_v15 = vsel %vm402_vm1, %v591_v59, %v596_v7 }
  0x3b   : > { %v379_v12 = vadd.f32 %v378_v10, %v377_v62  ;;  %v572_v14 = vadd.f32 %v570_v53, %v560_v63  ;;  %v599_v16 = vsel %vm402_vm1, %v594_v61, %v598_v9  ;;  %v604_v19 = vsub.f32 %v348_v4, %v592_v32 }
  0x3c   : > { %v573_v17 = vadd.f32 %v571_v56, %v561_v11  ;;  %v605_v20 = vsub.f32 %v349_v5, %v595_v8  ;;  %v606_v21 = vsub.f32 %v350_v6, %v597_v15  ;;  %v607_v54 = vsub.f32 %v351_v13, %v599_v16 }
  0x3d   : > { %380 = vadd.xlane.f32.xlu0 %v379_v12  ;;  %v574_v23 = vsel %vm402_vm1, %v572_v14, 0.0  ;;  %v608_v24 = vand.u32 2147483647, %v604_v19  ;;  %v479_v34 = vadd.f32 %v478_v22, %v1197_v60 }
  0x3e   : > { %v575_v55 = vsel %vm402_vm1, %v573_v17, 0.0  ;;  %v609_v26 = vand.u32 2147483647, %v605_v20  ;;  %v610_v29 = vand.u32 2147483647, %v606_v21 }
  0x3f   : > { %v576_v27 = vadd.f32 %v575_v55, %v574_v23  ;;  %v611_v31 = vand.u32 2147483647, %v607_v54  ;;  %v614_v36 = vrot.slane %v608_v24, 1 }
  0x40   : > { %v615_v37 = vrot.slane %v609_v26, 1  ;;  %v624_v39 = vrot.slane %v610_v29, 6  ;;  %v630_v3 = vrot.slane %v610_v29, 7  ;;  %v666_v43 = vrot.slane %v610_v29, 1 }
  0x41   : > { %577 = vadd.xlane.f32.xlu1 %v576_v27  ;;  %444 = vadd.xlane.f32.xlu0 %v443_v18  ;;  %v625_v2 = vrot.slane %v611_v31, 6  ;;  %v631_v40 = vrot.slane %v611_v31, 7  ;;  %v618_v41 = vadd.f32 %v614_v36, %v608_v24  ;;  %v667_v44 = vrot.slane %v611_v31, 1 }
  0x42   : > { %v619_v35 = vadd.f32 %v615_v37, %v609_v26  ;;  %v670_v30 = vadd.f32 %v666_v43, %v610_v29 }
  0x43   : > { %v628_v25 = vadd.f32 %v624_v39, %v618_v41  ;;  %v671_v47 = vadd.f32 %v667_v44, %v611_v31  ;;  %v620_v60 = vmul.f32 %v618_v41, %v1133_v0 }
  0x44   : > { %v629_v46 = vadd.f32 %v625_v2, %v619_v35  ;;  %v621_v51 = vmul.f32 %v619_v35, %v1136_v1  ;;  %v672_v61 = vmul.f32 %v670_v30, %v1185_v45 }
  0x45   : > { %480 = vadd.xlane.f32.xlu0 %v479_v34  ;;  %v634_v48 = vadd.f32 %v630_v3, %v628_v25  ;;  %v673_v62 = vmul.f32 %v671_v47, %v1189_v49 }
  0x46   : > { %v635_v50 = vadd.f32 %v631_v40, %v629_v46  ;;  %v676_v10 = vrot.slane %v672_v61, 6 }
  0x47   : > { %v636_v52 = vmul.f32 %v634_v48, %v522_v38  ;;  %v646_v56 = vmul.f32 %v634_v48, %v1185_v45  ;;  %v656_v58 = vmul.f32 %v634_v48, %v1168_v28  ;;  %v677_v11 = vrot.slane %v673_v62, 6 }
  0x48   : > { %v637_v53 = vmul.f32 %v635_v50, %v523_v42  ;;  %v647_v57 = vmul.f32 %v635_v50, %v1189_v49  ;;  %v657_v59 = vmul.f32 %v635_v50, %v1174_v33 }
  0x49   : > { %v640_v63 = vrot.slane %v636_v52, 2  ;;  %v650_v5 = vrot.slane %v646_v56, 4  ;;  %v660_v1 = vrot.slane %v656_v58, 6 }
  0x4a   : > { %v641_v4 = vrot.slane %v637_v53, 2  ;;  %v651_v0 = vrot.slane %v647_v57, 4  ;;  %v661_v42 = vrot.slane %v657_v59, 6 }
  0x4b   : > { %v644_v38 = vadd.f32 %v640_v63, %v620_v60 }
  0x4c   : > { %v645_v6 = vadd.f32 %v641_v4, %v621_v51 }
  0x4d   : > { %v654_v7 = vadd.f32 %v650_v5, %v644_v38 }
  0x4e   : > { %v655_v9 = vadd.f32 %v651_v0, %v645_v6 }
  0x4f   : > { %v664_v13 = vadd.f32 %v660_v1, %v654_v7 }
  0x50   : > { %v665_v28 = vadd.f32 %v661_v42, %v655_v9 }
  0x51   : > { %v680_v32 = vadd.f32 %v676_v10, %v664_v13 }
  0x52   : > { %v681_v33 = vadd.f32 %v677_v11, %v665_v28 }
  0x53   : > { %v682_v45 = vsel %vm402_vm1, %v680_v32, 0.0 }
  0x54   : > { %v683_v49 = vsel %vm402_vm1, %v681_v33, 0.0 }
  0x55   : > { %v684_v8 = vadd.f32 %v683_v49, %v682_v45 }
  0x57   : > { %685 = vadd.xlane.f32.xlu0 %v684_v8 }
  0xb0   : > { %v407_v12 = vpop.xlane.xlu1 %406  ;;  %v393_v15 = vpop.xlane.xlu0 %392 }
  0xb1   : > { %v394_v16 = vrot.slane %v393_v15, 4  ;;  %v408_v17 = vrot.slane %v407_v12, 4 }
  0xb3   : > { %v395_v21 = vadd.f32 %v394_v16, %v393_v15  ;;  %v409_v23 = vadd.f32 %v408_v17, %v407_v12 }
  0xb4   : > { %v427_v14 = vpop.xlane.xlu1 %426 }
  0xb5   : > { %v428_v20 = vrot.slane %v427_v14, 4  ;;  %v396_v54 = vrot.slane %v395_v21, 2  ;;  %v410_v55 = vrot.slane %v409_v23, 2 }
  0xb7   : > { %v429_v22 = vadd.f32 %v428_v20, %v427_v14  ;;  %v397_v39 = vadd.f32 %v396_v54, %v395_v21  ;;  %v411_v2 = vadd.f32 %v410_v55, %v409_v23 }
  0xb8   : > { %v463_v19 = vpop.xlane.xlu1 %462 }
  0xb9   : > { %v464_v18 = vrot.slane %v463_v19, 4  ;;  %v430_v29 = vrot.slane %v429_v22, 2  ;;  %v398_v30 = vrot.slane %v397_v39, 1  ;;  %v412_v47 = vrot.slane %v411_v2, 1 }
  0xbb   : > { %v465_v24 = vadd.f32 %v464_v18, %v463_v19  ;;  %v431_v35 = vadd.f32 %v430_v29, %v429_v22  ;;  %v399_v61 = vadd.f32 %v398_v30, %v397_v39  ;;  %v413_v4 = vadd.f32 %v412_v47, %v411_v2 }
  0xbd   : > { %v466_v34 = vrot.slane %v465_v24, 2  ;;  %v432_v53 = vrot.slane %v431_v35, 1 }
  0xbf   : > { %v467_v48 = vadd.f32 %v466_v34, %v465_v24  ;;  %v433_v0 = vadd.f32 %v432_v53, %v431_v35 }
  0xc1   : > { %v468_v62 = vrot.slane %v467_v48, 1 }
  0xc3   : > { %v469_v1 = vadd.f32 %v468_v62, %v467_v48 }
  0xca   : > { %v381_v26 = vpop.xlane.xlu0 %380 }
  0xcb   : > { %v382_v27 = vrot.slane %v381_v26, 4 }
  0xcd   : > { %v383_v31 = vadd.f32 %v382_v27, %v381_v26 }
  0xce   : > { %v578_v36 = vpop.xlane.xlu1 %577  ;;  %v445_v37 = vpop.xlane.xlu0 %444 }
  0xcf   : > { %v384_v3 = vrot.slane %v383_v31, 2  ;;  %v579_v40 = vrot.slane %v578_v36, 4  ;;  %v446_v41 = vrot.slane %v445_v37, 4 }
  0xd1   : > { %v580_v43 = vadd.f32 %v579_v40, %v578_v36  ;;  %v447_v44 = vadd.f32 %v446_v41, %v445_v37  ;;  %v385_v25 = vadd.f32 %v384_v3, %v383_v31 }
  0xd2   : > { %v481_v46 = vpop.xlane.xlu0 %480 }
  0xd3   : > { %v581_v50 = vrot.slane %v580_v43, 2  ;;  %v448_v60 = vrot.slane %v447_v44, 2  ;;  %v482_v51 = vrot.slane %v481_v46, 4  ;;  %v386_v52 = vrot.slane %v385_v25, 1 }
  0xd5   : > { %v483_v56 = vadd.f32 %v482_v51, %v481_v46  ;;  %v387_v57 = vadd.f32 %v386_v52, %v385_v25  ;;  %v449_v58 = vadd.f32 %v448_v60, %v447_v44  ;;  %v582_v59 = vadd.f32 %v581_v50, %v580_v43 }
  0xd7   : > { %v484_v63 = vrot.slane %v483_v56, 2  ;;  %876 = vpush %v387_v57  ;;  %v450_v5 = vrot.slane %v449_v58, 1  ;;  %v583_v42 = vrot.slane %v582_v59, 1 }
  0xd8   : > { %878 = vpush %v399_v61 }
  0xd9   : > { %880 = vpush %v413_v4  ;;  %v451_v38 = vadd.f32 %v450_v5, %v449_v58  ;;  %v485_v6 = vadd.f32 %v484_v63, %v483_v56  ;;  %v584_v10 = vadd.f32 %v583_v42, %v582_v59 }
  0xda   : > { %882 = vpush %v433_v0 }
  0xdb   : > { %884 = vpush %v451_v38  ;;  %v486_v7 = vrot.slane %v485_v6, 1 }
  0xdc   : > { %886 = vpush %v469_v1 }
  0xdd   : > { %v487_v9 = vadd.f32 %v486_v7, %v485_v6 }
  0xdf   : > { %888 = vpush %v487_v9 }
  0xe0   : > { %890 = vpush %v584_v10 }
  0xe4   : > { %v686_v11 = vpop.xlane.xlu0 %685 }
  0xe5   : > { %v687_v13 = vrot.slane %v686_v11, 4 }
  0xe7   : > { %v688_v28 = vadd.f32 %v687_v13, %v686_v11 }
  0xe9   : > { %v689_v32 = vrot.slane %v688_v28, 2 }
  0xeb   : > { %v690_v33 = vadd.f32 %v689_v32, %v688_v28 }
  0xed   : > { %v691_v45 = vrot.slane %v690_v33, 1 }
  0xef   : > { %v692_v49 = vadd.f32 %v691_v45, %v690_v33 }
  0xf1   : > { %892 = vpush %v692_v49 }
 0x108   : > { %s877_s29 = spop %876 }
 0x109   : > { %s879_s30 = spop %878  ;;  %v694_v12 = vstv %s877_s29 }
 0x10a   : > { %s881_s5 = spop %880  ;;  %s401_s2 = smul.f32 2.0, %s879_s30 }
 0x10b   : > { %s883_s6 = spop %882  ;;  %s415_s7 = smul.f32 2.0, %s881_s5 }
 0x10c   : > { %s885_s8 = spop %884  ;;  %s435_s9 = smul.f32 4.0, %s883_s6  ;;  %v696_v15 = vstv %s401_s2 }
 0x10d   : > { %s453_s10 = smul.f32 4.0, %s885_s8  ;;  %s887_s12 = spop %886 }
 0x10e   : > { %s436_s11 = sadd.f32 %s435_s9, %s415_s7  ;;  %s471_s21 = smul.f32 4.0, %s887_s12 }
 0x10f   : > { %s869_s6 = sshll.u32 %s1027_s18, 7  ;;  %s293_s7 = scalar_lea.vmem [#allocation2], %s859_s1 }
 0x110   : > { %s454_s13 = sadd.f32 %s453_s10, %s436_s11  ;;  %s889_s14 = spop %888 }
 0x111   : > { %s489_s22 = smul.f32 2.0, %s889_s14  ;;  %s891_s0 = spop %890 }
 0x112   : > { %s472_s26 = sadd.f32 %s471_s21, %s454_s13  ;;  %v695_v8 = vstv %s891_s0  ;;  %s726_s0 = sshll.u32 %s293_s7, 4  ;;  %s1272_s0 = int_to_ptr.vmem [resolvable:$true] %s726_s0 }
 0x113   : > { %v699_v14 = vsel %vm402_vm1, %v694_v12, %v695_v8  ;;  %s1270_s2 = scalar_lea.hbm %s1321_s4, %s869_s6  ;;  %s957_s1 = scalar_lea.vmem %s1272_s0, 128 }
 0x114   : > { %s490_s3 = sadd.f32 %s489_s22, %s472_s26  ;;  %v701_v19 = vsel %vm700_vm3, %v699_v14, %v696_v15  ;;  %p958_p12 = scmp.ne.s32.totalorder %s1272_s0, %s957_s1 }
 0x115   : > { %s1037_s18 = smov [#allocation2]  }
 0x116   : > { %v698_v16 = vstv %s490_s3  ;;  %s712_s3 = scalar_lea.sflag [#allocation3], %s291_s24  ;;  %p959_p13 = pnand %p958_p12, %p1103_p4 }
 0x117   : > { %s961_s8 = sshll.u32 %s1037_s18, 4  ;;  %s962_s8 = int_to_ptr.vmem [resolvable:$false] %s961_s8 }
 0x118   : > { %p960_p0 = pneg %p959_p13  ;;  %s963_s9 = scalar_lea.vmem %s962_s8, 256 }
 0x119   : > { %p964_p1 = scmp.lt.s32.totalorder %s1272_s0, %s962_s8  ;;  %p965_p2 = scmp.lt.s32.totalorder %s963_s9, %s957_s1 }
 0x11b   : > { %p966_p3 = por %p965_p2, %p964_p1 }
 0x11d   : > { %p967_p5 = pnand %p966_p3, %p960_p0 }
 0x122   : > { %s893_s5 = spop %892 }
 0x123   : > { %v697_v17 = vstv %s893_s5 }
 0x124   : > { %v702_v20 = vsel %vm493_vm2, %v701_v19, %v697_v17 }
 0x125   : > { %v704_v21 = vsel %vm703_vm4, %v702_v20, %v698_v16 }
 0x126   : > { %v705_v23 = vsel %vm376_vm0, %v704_v21, 0.0 }
 0x127   : > { %v707_v18 = vsel %vm706_vm5, %v705_v23, 0.0 }
 0x128   : > { %v709_v22 = vsel %vm708_vm6, %v707_v18, 0.0 }
 0x129   : > { %710 = vst [vmem:[%s293_s7] sm:$0xff] %v709_v22 }
 0x12a   : > { %970 = shalt.err (!%p967_p5)
}
 0x12b   : > { %s971_s10 = scalar_lea.hbm %s1270_s2, 128  ;;  %s975_s13 = scalar_lea.hbm %s1321_s4, 256 }
 0x12c   : > { %p972_p6 = scmp.ne.s32.totalorder %s1270_s2, %s971_s10  ;;  %p976_p10 = scmp.lt.u32.totalorder %s1270_s2, %s1321_s4 }
 0x12d   : > { %p977_p11 = scmp.lt.u32.totalorder %s975_s13, %s971_s10  ;;  %p979_p13 = scmp.lt.u32.totalorder %s971_s10, %s1270_s2 }
 0x12e   : > { %p973_p7 = pnand %p972_p6, %p1103_p4 }
 0x12f   : > { %p978_p12 = por %p977_p11, %p976_p10 }
 0x130   : > { %p974_p9 = pneg %p973_p7 }
 0x131   : > { %p980_p0 = por %p979_p13, %p978_p12 }
 0x133   : > { %p981_p1 = pnand %p980_p0, %p974_p9 }
 0x135   : > { %984 = shalt.err (!%p981_p1)
}
 0x136   : > { %894 = dma.vmem_to_hbm [thread:$0]  (%p1103_p4), %s1272_s0, 128, %s1270_s2, %s712_s3  }
 0x137 PF: > { %p900_p2 = scmp.ge.s32.totalorder %s1035_s20, 2  ;;  %s738_s22 = sand.u32 1, %s1015_s15  }
 0x138   : > { %s739_s24 = scalar_lea.sflag [#allocation3], %s738_s22 }
 0x139   : > { %p897_p3 = pnand %p900_p2, %p1110_p8 }
 0x13b   : > { %1010 = dma.done.wait (!%p897_p3), %s739_s24, 128  }
 0x13c   : > { %1012 = vsyncadd (!%p897_p3), %s739_s24, 4294967168  ;;  %s17_s20 = sadd.s32 1, %s1035_s20   ;;  %s1332_s15 = smov %s1019_s16 }
 0x13d   : > { %p14_p5 = scmp.ge.s32.totalorder %s17_s20, 4   ;;  %s1333_s16 = smov %s1023_s17 }
 0x13e   : > { %s1334_s17 = smov %s1116_s28  ;;  %s1335_s18 = smov %s1031_s19 }
 0x13f   : > { %s1336_s19 = smov %s1338_s23  ;;  %16 = sbr.rel (!%p14_p5) target bundleno = 9 (0x9), region = 80 }
 0x146   :  { %744 = vsyncpa [#allocation3], 1 }
 0x147   :  { %746 = vsyncpa [#allocation3 + $0x1], 1 }

</bundles_post_ra>
